<compile_context>
chip_gen: v7x
topology: tpu7x:2x2x1
jax: 0.10.0
libtpu: 0.0.40
codegen_flags: <defaults>
</compile_context>

<pallas_src>
import functools

import jax
import jax.numpy as jnp
from jax.experimental import pallas as pl
from jax.experimental.pallas import tpu as pltpu


def _round_up(n, m):
    return ((n + m - 1) // m) * m


def _critic_kernel(xt_ref, w1t_ref, b1_ref, w2t_ref, b2_ref, w3c_ref, b3_ref,
                   out_ref):
    # xt_ref: (in_size, TB)   batch on lanes
    xt = xt_ref[...]

    # Layer 1: (h, in) @ (in, TB) -> (h, TB), bias broadcast over lanes.
    h1 = jnp.tanh(
        jnp.dot(w1t_ref[...], xt, preferred_element_type=jnp.float32)
        + b1_ref[...])

    # Layer 2: (h, h) @ (h, TB) -> (h, TB)
    h2 = jnp.tanh(
        jnp.dot(w2t_ref[...], h1, preferred_element_type=jnp.float32)
        + b2_ref[...])

    # Layer 3 (out_features = 1): VPU multiply + sublane reduction instead of
    # an MXU matmul with a single output column.
    y = jnp.sum(h2 * w3c_ref[...], axis=0, keepdims=True) + b3_ref[0, 0]

    out_ref[...] = y.astype(out_ref.dtype)          # (1, TB), lane-dense store


def svpg_particle_critic_forward(x, params, *, block_b=512):
    """x: (B, in_size) float32.  params: dict w1,b1,w2,b2,w3,b3 in (in, out) layout.

    Returns (B, 1) float32, matching the PyTorch module's forward.
    """
    B, in_size = x.shape
    h = params["w1"].shape[1]

    # Batch tile: multiple of 128 (lane width), capped by block_b.
    TB = min(block_b, _round_up(B, 128))
    B_pad = _round_up(B, TB)
    grid = (B_pad // TB,)

    # One-time layout plumbing outside the kernel: pad batch, put batch on the
    # lane axis, and pre-transpose weights to (out, in).
    x_pad = jnp.pad(x, ((0, B_pad - B), (0, 0)))
    xt = x_pad.T                                   # (in_size, B_pad)
    w1t = params["w1"].T                           # (h, in_size)
    b1c = params["b1"].reshape(h, 1)               # (h, 1)
    w2t = params["w2"].T                           # (h, h)
    b2c = params["b2"].reshape(h, 1)               # (h, 1)
    w3c = params["w3"].reshape(h, 1)               # (h, 1)
    b3s = params["w3"].dtype.type(0) + params["b3"].reshape(1, 1)  # (1, 1)

    const2d = lambda arr: pl.BlockSpec(arr.shape, lambda i: (0, 0))

    flops = 2 * B_pad * (in_size * h + h * h + h)
    transcendentals = 2 * B_pad * h
    bytes_accessed = 4 * (in_size * B_pad + B_pad            # x in, y out
                          + in_size * h + h * h + h          # weights
                          + 2 * h + 1)                       # biases

    out = pl.pallas_call(
        _critic_kernel,
        out_shape=jax.ShapeDtypeStruct((1, B_pad), jnp.float32),
        grid=grid,
        in_specs=[
            pl.BlockSpec((in_size, TB), lambda i: (0, i)),   # x^T batch tile
            const2d(w1t),
            const2d(b1c),
            const2d(w2t),
            const2d(b2c),
            const2d(w3c),
            pl.BlockSpec((1, 1), lambda i: (0, 0),
                         memory_space=pltpu.MemorySpace.SMEM),  # scalar b3
        ],
        out_specs=pl.BlockSpec((1, TB), lambda i: (0, i)),
        compiler_params=pltpu.CompilerParams(
            dimension_semantics=("parallel",),
            vmem_limit_bytes=32 * 1024 * 1024,
        ),
        cost_estimate=pl.CostEstimate(
            flops=flops,
            transcendentals=transcendentals,
            bytes_accessed=bytes_accessed,
        ),
    )(xt, w1t, b1c, w2t, b2c, w3c, b3s)

    return out[0, :B].reshape(B, 1)


def init_params(key, in_size, h):
    """Deterministic init matching the module's parameter shapes.

    PyTorch Linear stores W as (out, in); we keep the transposed (in, out)
    layout here (the wrapper re-transposes for the kernel).  orthogonal_init in
    the reference is the identity, so any deterministic init reproduces the
    forward semantics."""
    k1, k2, k3, k4, k5, k6 = jax.random.split(key, 6)

    def u(k, shape, fan_in):
        bound = 1.0 / jnp.sqrt(fan_in)
        return jax.random.uniform(k, shape, jnp.float32, -bound, bound)

    return {
        "w1": u(k1, (in_size, h), in_size),
        "b1": u(k2, (1, h), in_size),
        "w2": u(k3, (h, h), h),
        "b2": u(k4, (1, h), h),
        "w3": u(k5, (h, 1), h),
        "b3": u(k6, (1, 1), h),
    }


def _reference(x, p):
    h1 = jnp.tanh(x @ p["w1"] + p["b1"])
    h2 = jnp.tanh(h1 @ p["w2"] + p["b2"])
    return h2 @ p["w3"] + p["b3"]


if __name__ == "__main__":
    key = jax.random.PRNGKey(0)
    kx, kp = jax.random.split(key)

    # Small shapes consistent with the module; B chosen so the batch grid has
    # multiple tiles (and exercises edge padding) with block_b=128.
    B, in_size, h = 200, 4, 32
    x = jax.random.normal(kx, (B, in_size), dtype=jnp.float32)
    params = init_params(kp, in_size, h)

    fwd = jax.jit(functools.partial(svpg_particle_critic_forward, block_b=128))
    out = jax.block_until_ready(fwd(x, params))

    ref = _reference(x, params)
    assert out.shape == (B, 1), out.shape
    assert jnp.allclose(out, ref, atol=1e-5, rtol=1e-5), (
        float(jnp.max(jnp.abs(out - ref))))

    print("KERNEL_OK")
</pallas_src>

<mosaic_0001>
module attributes {stable_mosaic.version = 11 : i64} {
  func.func @_critic_kernel(%arg0: i32, %arg1: memref<4x128xf32, #tpu.memory_space<vmem>>, %arg2: memref<32x4xf32, #tpu.memory_space<vmem>>, %arg3: memref<32x1xf32, #tpu.memory_space<vmem>>, %arg4: memref<32x32xf32, #tpu.memory_space<vmem>>, %arg5: memref<32x1xf32, #tpu.memory_space<vmem>>, %arg6: memref<32x1xf32, #tpu.memory_space<vmem>>, %arg7: memref<1x1xf32, #tpu.memory_space<smem>>, %arg8: memref<1x128xf32, #tpu.memory_space<vmem>>) attributes {dimension_semantics = [#tpu.dimension_semantics<parallel>], iteration_bounds = array<i64: 2>, scalar_prefetch = 0 : i64, scratch_operands = 0 : i64, tpu.core_type = #tpu.core_type<tc>, window_params = [{transform_indices = @transform_0, window_bounds = array<i64: 4, 128>}, {pipeline_mode = #tpu.pipeline_mode<synchronous>, transform_indices = @transform_1, window_bounds = array<i64: 32, 4>}, {pipeline_mode = #tpu.pipeline_mode<synchronous>, transform_indices = @transform_2, window_bounds = array<i64: 32, 1>}, {pipeline_mode = #tpu.pipeline_mode<synchronous>, transform_indices = @transform_3, window_bounds = array<i64: 32, 32>}, {pipeline_mode = #tpu.pipeline_mode<synchronous>, transform_indices = @transform_4, window_bounds = array<i64: 32, 1>}, {pipeline_mode = #tpu.pipeline_mode<synchronous>, transform_indices = @transform_5, window_bounds = array<i64: 32, 1>}, {transform_indices = @transform_6, window_bounds = array<i64: 1, 1>}, {transform_indices = @transform_7, window_bounds = array<i64: 1, 128>}]} {
    %c0 = arith.constant 0 : index
    %c0_0 = arith.constant 0 : index
    %0 = vector.load %arg1[%c0, %c0_0] : memref<4x128xf32, #tpu.memory_space<vmem>>, vector<4x128xf32>
    %c0_1 = arith.constant 0 : index
    %c0_2 = arith.constant 0 : index
    %1 = vector.load %arg2[%c0_1, %c0_2] : memref<32x4xf32, #tpu.memory_space<vmem>>, vector<32x4xf32>
    %cst = arith.constant dense<0.000000e+00> : vector<32x128xf32>
    %2 = tpu.matmul %1, %0, %cst {dimension_numbers = #tpu.dot_dimension_numbers<[1], [0], [0], [1], [0, 0, 1, 1], [], []>} : vector<32x4xf32>, vector<4x128xf32>, vector<32x128xf32> -> vector<32x128xf32>
    %c0_3 = arith.constant 0 : index
    %c0_4 = arith.constant 0 : index
    %3 = vector.load %arg3[%c0_3, %c0_4] : memref<32x1xf32, #tpu.memory_space<vmem>>, vector<32x1xf32>
    %4 = vector.broadcast %3 : vector<32x1xf32> to vector<32x128xf32>
    %5 = arith.addf %2, %4 : vector<32x128xf32>
    %6 = math.tanh %5 : vector<32x128xf32>
    %c0_5 = arith.constant 0 : index
    %c0_6 = arith.constant 0 : index
    %7 = vector.load %arg4[%c0_5, %c0_6] : memref<32x32xf32, #tpu.memory_space<vmem>>, vector<32x32xf32>
    %cst_7 = arith.constant dense<0.000000e+00> : vector<32x128xf32>
    %8 = tpu.matmul %7, %6, %cst_7 {dimension_numbers = #tpu.dot_dimension_numbers<[1], [0], [0], [1], [0, 0, 1, 1], [], []>} : vector<32x32xf32>, vector<32x128xf32>, vector<32x128xf32> -> vector<32x128xf32>
    %c0_8 = arith.constant 0 : index
    %c0_9 = arith.constant 0 : index
    %9 = vector.load %arg5[%c0_8, %c0_9] : memref<32x1xf32, #tpu.memory_space<vmem>>, vector<32x1xf32>
    %10 = vector.broadcast %9 : vector<32x1xf32> to vector<32x128xf32>
    %11 = arith.addf %8, %10 : vector<32x128xf32>
    %12 = math.tanh %11 : vector<32x128xf32>
    %c0_10 = arith.constant 0 : index
    %c0_11 = arith.constant 0 : index
    %13 = vector.load %arg6[%c0_10, %c0_11] : memref<32x1xf32, #tpu.memory_space<vmem>>, vector<32x1xf32>
    %14 = vector.broadcast %13 : vector<32x1xf32> to vector<32x128xf32>
    %15 = arith.mulf %12, %14 : vector<32x128xf32>
    %cst_12 = arith.constant dense<0.000000e+00> : vector<128xf32>
    %16 = vector.multi_reduction <add>, %15, %cst_12 [0] : vector<32x128xf32> to vector<128xf32>
    %17 = vector.shape_cast %16 : vector<128xf32> to vector<1x128xf32>
    %c0_13 = arith.constant 0 : index
    %c0_14 = arith.constant 0 : index
    %18 = memref.load %arg7[%c0_13, %c0_14] : memref<1x1xf32, #tpu.memory_space<smem>>
    %19 = vector.broadcast %18 : f32 to vector<1x128xf32>
    %20 = arith.addf %17, %19 : vector<1x128xf32>
    %c0_15 = arith.constant 0 : index
    %c0_16 = arith.constant 0 : index
    %21 = vector.load %arg8[%c0_15, %c0_16] : memref<1x128xf32, #tpu.memory_space<vmem>>, vector<1x128xf32>
    tpu.vector_store %arg8[%c0_15, %c0_16], %20 {strides = array<i32>} : memref<1x128xf32, #tpu.memory_space<vmem>>, vector<1x128xf32>,
    return
  }
  func.func @transform_0(%arg0: i32) -> (i32, i32) {
    %c0_i32 = arith.constant 0 : i32
    %c0_i32_0 = arith.constant 0 : i32
    return %c0_i32, %arg0 : i32, i32
  }
  func.func @transform_1(%arg0: i32) -> (i32, i32) {
    %c0_i32 = arith.constant 0 : i32
    %c0_i32_0 = arith.constant 0 : i32
    %c0_i32_1 = arith.constant 0 : i32
    return %c0_i32, %c0_i32_0 : i32, i32
  }
  func.func @transform_2(%arg0: i32) -> (i32, i32) {
    %c0_i32 = arith.constant 0 : i32
    %c0_i32_0 = arith.constant 0 : i32
    %c0_i32_1 = arith.constant 0 : i32
    return %c0_i32, %c0_i32_0 : i32, i32
  }
  func.func @transform_3(%arg0: i32) -> (i32, i32) {
    %c0_i32 = arith.constant 0 : i32
    %c0_i32_0 = arith.constant 0 : i32
    %c0_i32_1 = arith.constant 0 : i32
    return %c0_i32, %c0_i32_0 : i32, i32
  }
  func.func @transform_4(%arg0: i32) -> (i32, i32) {
    %c0_i32 = arith.constant 0 : i32
    %c0_i32_0 = arith.constant 0 : i32
    %c0_i32_1 = arith.constant 0 : i32
    return %c0_i32, %c0_i32_0 : i32, i32
  }
  func.func @transform_5(%arg0: i32) -> (i32, i32) {
    %c0_i32 = arith.constant 0 : i32
    %c0_i32_0 = arith.constant 0 : i32
    %c0_i32_1 = arith.constant 0 : i32
    return %c0_i32, %c0_i32_0 : i32, i32
  }
  func.func @transform_6(%arg0: i32) -> (i32, i32) {
    %c0_i32 = arith.constant 0 : i32
    %c0_i32_0 = arith.constant 0 : i32
    %c0_i32_1 = arith.constant 0 : i32
    return %c0_i32, %c0_i32_0 : i32, i32
  }
  func.func @transform_7(%arg0: i32) -> (i32, i32) {
    %c0_i32 = arith.constant 0 : i32
    %c0_i32_0 = arith.constant 0 : i32
    return %c0_i32, %arg0 : i32, i32
  }
}

</mosaic_0001>

<bundles_post_ra>
// kernel: svpg_particle_critic_forward.1
= control target key start
LH: loop header
LB: loop body
LE: loop exit
PB: predicated region body
PF: predicated region fallthrough
CT: control target
= control target key end

     0   :  { %s769_s26 = smov 0   ;;  %s858_s0 = inlined_call_operand.vmem [shape: f32[4,256], index: 0, kind: input, shape index: {}]   ;;  %s859_s1 = inlined_call_operand.vmem [shape: f32[32,4], index: 1, kind: input, shape index: {}]   ;;  %s860_s2 = inlined_call_operand.vmem [shape: f32[32,1], index: 2, kind: input, shape index: {}]   ;;  %s861_s3 = inlined_call_operand.vmem [shape: f32[32,32], index: 3, kind: input, shape index: {}]   ;;  %s862_s4 = inlined_call_operand.vmem [shape: f32[32,1], index: 4, kind: input, shape index: {}]   ;;  %s863_s5 = inlined_call_operand.vmem [shape: f32[32,1], index: 5, kind: input, shape index: {}]   ;;  %s864_s6 = inlined_call_operand.<no memory space> [shape: f32[1,1], index: 6, kind: input, shape index: {}]   ;;  %s865_s7 = inlined_call_operand.vmem [shape: f32[1,256], index: 7, kind: output, shape index: {}]  }
   0x1   :  { %12 = sst [smem:[#allocation2]] %s864_s6 }
   0x2 LB: > { %s626_s27 = sadd.s32 4294967295, %s723_s26   ;;  %p630_p0 = scmp.ge.s32.totalorder %s723_s26, 1  ;;  %s723_s26 = sphi %s769_s26, %s18_s26  }
   0x3   : > { %p237_p1 = scmp.lt.s32.totalorder %s723_s26, 3 }
   0x5   : > { %p238_p2 = pnand %p630_p0, %p237_p1 }
   0x6   : > { %p266_p3 = scmp.lt.s32.totalorder (!%p238_p2), %s626_s27, 1  ;;  %v274_v0 = vld [vmem:[%s859_s1] sm:$0xff] (!%p238_p2)  ;;  %vm302_vm0 = vcmask (!%p238_p2), 31744   ;;  %v280_v2 = vld [vmem:[%s860_s2 + $0x10] sm:$0xff] (!%p238_p2)  ;;  %v725_v3 = vmov (!%p238_p2), 0   ;;  %vm315_vm1 = vcmask (!%p238_p2), 1043456  }
   0x7   : > { %241 = sbr.rel (%p238_p2) target bundleno = 505 (0x1f9), region = 48  ;;  %658 = vmatprep.mubr.msk.f32.mxu0 (!%p238_p2), %vm302_vm0, %v274_v0  ;;  %v278_v1 = vld [vmem:[%s860_s2] sm:$0xff] (!%p238_p2)  ;;  %699 = vset.pattern.permute.xlu0 (!%p238_p2), %v725_v3  ;;  %v279_v4 = vld [vmem:[%s860_s2 + $0x8] sm:$0xff] (!%p238_p2)  ;;  %v281_v5 = vld [vmem:[%s860_s2 + $0x18] sm:$0xff] (!%p238_p2)  ;;  %vm436_vm2 = vcmask (!%p238_p2), 261120   ;;  %s575_s28 = sld [smem:[#allocation2]] (!%p238_p2) }
   0x8   : > { %700 = vset.pattern.permute.xlu1 (!%p238_p2), %v725_v3  ;;  %284 = vperm.xlu0 (!%p238_p2), %699, %v278_v1   ;;  %v275_v7 = vld [vmem:[%s859_s1 + $0x8] sm:$0xff] (!%p238_p2)  ;;  %v276_v8 = vld [vmem:[%s859_s1 + $0x10] sm:$0xff] (!%p238_p2)  ;;  %v412_v9 = vld [vmem:[%s862_s4] sm:$0xff] (!%p238_p2) }
   0x9   : > { %294 = vperm.xlu1 (!%p238_p2), %700, %v280_v2   ;;  %v413_v10 = vld [vmem:[%s862_s4 + $0x8] sm:$0xff] (!%p238_p2)  ;;  %v277_v11 = vld [vmem:[%s859_s1 + $0x18] sm:$0xff] (!%p238_p2)  ;;  %v414_v12 = vld [vmem:[%s862_s4 + $0x10] sm:$0xff] (!%p238_p2) }
   0xa   : > { %v415_v13 = vld [vmem:[%s862_s4 + $0x18] sm:$0xff] (!%p238_p2)  ;;  %v538_v14 = vld [vmem:[%s863_s5] sm:$0xff] (!%p238_p2)  ;;  %v539_v15 = vld [vmem:[%s863_s5 + $0x8] sm:$0xff] (!%p238_p2) }
   0xb   : > { %v540_v16 = vld [vmem:[%s863_s5 + $0x10] sm:$0xff] (!%p238_p2)  ;;  %v541_v17 = vld [vmem:[%s863_s5 + $0x18] sm:$0xff] (!%p238_p2)  ;;  %v408_v18 = vld [vmem:[%s861_s3] sm:$0xff] (!%p238_p2) }
   0xc   : > { %289 = vperm.xlu0 (!%p238_p2), %699, %v279_v4   ;;  %v410_v19 = vld [vmem:[%s861_s3 + $0x10] sm:$0xff] (!%p238_p2)  ;;  %v409_v38 = vld [vmem:[%s861_s3 + $0x8] sm:$0xff] (!%p238_p2)  ;;  %v411_v39 = vld [vmem:[%s861_s3 + $0x18] sm:$0xff] (!%p238_p2) }
   0xd   : > { %299 = vperm.xlu1 (!%p238_p2), %700, %v281_v5   ;;  %675 = vmatprep.mubr.msk.f32.mxu1 (!%p238_p2), %vm436_vm2, %v410_v19 }
   0xe   : > { %s867_s27 = smov (!%p266_p3, %s626_s27), 1 }
   0xf   : > { %s631_s10 = sshll.u32 %s867_s27, 2  ;;  %s272_s30 = scalar_lea.vmem %s865_s7, %s867_s27 }
  0x10   : > { %s269_s15 = scalar_lea.vmem %s858_s0, %s631_s10  ;;  %418 = vperm.xlu0 %699, %v412_v9  }
  0x11   : > { %v273_v6 = vld [vmem:[%s269_s15] sm:$0xf]  ;;  %423 = vperm.xlu1 %700, %v413_v10  }
  0x12   : > { %656 = vmatprep.subr.msk.mxu0 %vm315_vm1, %v273_v6 }
  0x13   : > { %657 = vmatpush3.msk.msra.mxu0 %vm315_vm1, %v273_v6 }
  0x14   : > { %659 = vmatmul.mubr.msk.f32.vlgmr.msra.gmra.mrb[0].mxu0 %vm302_vm0, %v275_v7  ;;  %428 = vperm.xlu0 %699, %v414_v12  }
  0x15   : > { %661 = vmatprep.mubr.msk.f32.mxu0 %vm302_vm0, %v276_v8  ;;  %433 = vperm.xlu1 %700, %v415_v13   ;;  %v576_v8 = vstv %s575_s28 }
  0x18   : > { %662 = vmatmul.mubr.msk.f32.gmra.mrb[2].mxu0 %vm302_vm0, %v277_v11  ;;  %544 = vperm.xlu0 %699, %v538_v14  }
  0x19   : > { %549 = vperm.xlu1 %700, %v539_v15   ;;  %672 = vmatprep.mubr.msk.f32.mxu0 %vm436_vm2, %v408_v18 }
  0x1c   : > { %554 = vperm.xlu0 %699, %v540_v16  }
  0x1d   : > { %559 = vperm.xlu1 %700, %v541_v17  }
  0x87   : > { %v285_v20 = vpop.permute.xlu0 %284 }
  0x88   : > { %v295_v21 = vpop.permute.xlu1 %294 }
  0x8b   : > { %v290_v22 = vpop.permute.xlu0 %289 }
  0x8c   : > { %v300_v27 = vpop.permute.xlu1 %299 }
  0x8f   : > { %v419_v40 = vpop.permute.xlu0 %418 }
  0x90   : > { %v424_v41 = vpop.permute.xlu1 %423 }
  0x93   : > { %v429_v42 = vpop.permute.xlu0 %428 }
  0x94   : > { %v434_v48 = vpop.permute.xlu1 %433 }
  0x97   : > { %v545_v52 = vpop.permute.xlu0 %544 }
  0x98   : > { %v550_v54 = vpop.permute.xlu1 %549 }
  0x9b   : > { %v555_v60 = vpop.permute.xlu0 %554 }
  0x9c   : > { %v560_v63 = vpop.permute.xlu1 %559 }
  0xe7   : > { %v660_v23 = vpop.f32.mrb[0].mxu0 }
  0xe8   : > { %v391_v24 = vadd.f32 %v660_v23, %v290_v22  ;;  %v385_v25 = vpop.f32.mrb[1].mxu0 }
  0xe9   : > { %v386_v26 = vadd.f32 %v385_v25, %v285_v20 }
  0xea   : > { %701 = vtanh.f32 %v391_v24 }
  0xeb   : > { %703 = vtanh.f32 %v386_v26  ;;  %v663_v28 = vpop.f32.mrb[2].mxu0 }
  0xec   : > { %v401_v29 = vadd.f32 %v663_v28, %v300_v27  ;;  %v395_v30 = vpop.f32.mrb[3].mxu0 }
  0xed   : > { %v396_v31 = vadd.f32 %v395_v30, %v295_v21 }
  0xee   : > { %705 = vtanh.f32 %v401_v29 }
  0xef   : > { %707 = vtanh.f32 %v396_v31 }
  0xf4   : > { %v702_v32 = vpop.eup %701 }
  0xf5   : > { %v704_v33 = vpop.eup %703 }
  0xf6   : > { %v678_v34 = vpack.c.bf16 %v702_v32, %v704_v33 }
  0xf8   : > { %v706_v35 = vpop.eup %705  ;;  %679 = vmatprep.subr.bf16.mxu0 %v678_v34  ;;  %686 = vmatprep.subr.bf16.mxu1 %v678_v34 }
  0xf9   : > { %v708_v36 = vpop.eup %707  ;;  %681 = vmatpush3.bf16.msra.mxu0 %v678_v34  ;;  %688 = vmatpush3.bf16.msra.mxu1 %v678_v34 }
  0xfa   : > { %v682_v37 = vpack.c.bf16 %v706_v35, %v708_v36 }
  0xfc   : > { %683 = vmatprep.subr.bf16.mxu0 %v682_v37  ;;  %687 = vmatprep.subr.bf16.mxu1 %v682_v37 }
  0xfd   : > { %685 = vmatpush3.bf16.msra.mxu0 %v682_v37  ;;  %689 = vmatpush3.bf16.msra.mxu1 %v682_v37 }
 0x100   : > { %673 = vmatmul.mubr.msk.f32.vlgmr.msra.gmra.mrb[4].mxu0 %vm436_vm2, %v409_v38  ;;  %676 = vmatmul.mubr.msk.f32.vlgmr.msra.gmra.mrb[0].mxu1 %vm436_vm2, %v411_v39 }
 0x1d3   : > { %v674_v43 = vpop.f32.mrb[4].mxu0  ;;  %v677_v44 = vpop.f32.mrb[0].mxu1 }
 0x1d4   : > { %v521_v45 = vadd.f32 %v674_v43, %v424_v41  ;;  %v515_v46 = vpop.f32.mrb[5].mxu0  ;;  %v525_v47 = vpop.f32.mrb[1].mxu1  ;;  %v531_v51 = vadd.f32 %v677_v44, %v434_v48 }
 0x1d5   : > { %v516_v49 = vadd.f32 %v515_v46, %v419_v40  ;;  %v526_v50 = vadd.f32 %v525_v47, %v429_v42 }
 0x1d6   : > { %709 = vtanh.f32 %v521_v45 }
 0x1d7   : > { %711 = vtanh.f32 %v516_v49 }
 0x1d8   : > { %713 = vtanh.f32 %v526_v50 }
 0x1d9   : > { %715 = vtanh.f32 %v531_v51 }
 0x1e0   : > { %v710_v53 = vpop.eup %709 }
 0x1e1   : > { %v563_v55 = vmul.f32 %v710_v53, %v550_v54  ;;  %v712_v56 = vpop.eup %711 }
 0x1e2   : > { %v714_v57 = vpop.eup %713  ;;  %v562_v58 = vmul.f32 %v712_v56, %v545_v52 }
 0x1e3   : > { %v716_v59 = vpop.eup %715  ;;  %v564_v62 = vmul.f32 %v714_v57, %v555_v60 }
 0x1e4   : > { %v566_v61 = vadd.f32 %v563_v55, %v562_v58  ;;  %v565_v0 = vmul.f32 %v716_v59, %v560_v63 }
 0x1e6   : > { %v567_v1 = vadd.f32 %v566_v61, %v564_v62 }
 0x1e8   : > { %v568_v2 = vadd.f32 %v567_v1, %v565_v0 }
 0x1ea   : > { %v569_v3 = vrot.slane %v568_v2, 4 }
 0x1ec   : > { %v570_v4 = vadd.f32 %v569_v3, %v568_v2 }
 0x1ee   : > { %v571_v5 = vrot.slane %v570_v4, 2 }
 0x1f0   : > { %v572_v6 = vadd.f32 %v571_v5, %v570_v4 }
 0x1f2   : > { %v573_v7 = vrot.slane %v572_v6, 1 }
 0x1f4   : > { %v574_v9 = vadd.f32 %v573_v7, %v572_v6 }
 0x1f6   : > { %v577_v10 = vadd.f32 %v576_v8, %v574_v9 }
 0x1f8   : > { %578 = vst [vmem:[%s272_s30] sm:$0x1] %v577_v10 }
 0x1f9 PF: > { %s18_s26 = sadd.s32 1, %s723_s26  }
 0x1fa   : > { %p15_p4 = scmp.ge.s32.totalorder %s18_s26, 4  }
 0x1fc   :  { %17 = sbr.rel (!%p15_p4) target bundleno = 2 (0x2), region = 78 }

</bundles_post_ra>
